<compile_context>
chip_gen: v6e
topology: v6e:2x2x1
jax: 0.10.0
libtpu: 0.0.40
codegen_flags: <defaults>
</compile_context>

<pallas_src>
import math

import jax
import jax.numpy as jnp
from jax.experimental import pallas as pl
from jax.experimental.pallas import tpu as pltpu

_LANE = 128
_SUBLANE = 8
_TARGET_BLOCK_BYTES = 2 * 1024 * 1024  # ~2 MiB per buffer


def _copy_kernel(x_ref, o_ref):
    # Pure tile copy: the reshape already happened (for free) in the wrapper.
    o_ref[...] = x_ref[...]


def _tiled_copy_2d(x2: jax.Array) -> jax.Array:
    """Copy a lane-dense (rows, 128) array through a tiled Pallas kernel."""
    rows, lane = x2.shape
    itemsize = jnp.dtype(x2.dtype).itemsize

    # Row-tile sized for ~2 MiB per buffer, multiple of the sublane count.
    max_tr = max(_SUBLANE, (_TARGET_BLOCK_BYTES // (lane * itemsize)))
    max_tr = max(_SUBLANE, (max_tr // _SUBLANE) * _SUBLANE)
    if rows <= max_tr:
        tr = rows          # full first dim -> always a legal block shape
    else:
        tr = max_tr        # multiple of 8; partial last tile handled by Pallas

    grid = (pl.cdiv(rows, tr),)

    return pl.pallas_call(
        _copy_kernel,
        out_shape=jax.ShapeDtypeStruct((rows, lane), x2.dtype),
        grid_spec=pltpu.PrefetchScalarGridSpec(
            num_scalar_prefetch=0,
            grid=grid,
            in_specs=[pl.BlockSpec((tr, lane), lambda i: (i, 0))],
            out_specs=pl.BlockSpec((tr, lane), lambda i: (i, 0)),
        ),
        compiler_params=pltpu.CompilerParams(
            dimension_semantics=("parallel",),
        ),
    )(x2)


def _full_block_copy_2d(x2: jax.Array) -> jax.Array:
    """Fallback: single full-array block copy for shapes not divisible by 128."""
    n, f = x2.shape
    return pl.pallas_call(
        _copy_kernel,
        out_shape=jax.ShapeDtypeStruct((n, f), x2.dtype),
        grid_spec=pltpu.PrefetchScalarGridSpec(
            num_scalar_prefetch=0,
            grid=(1,),
            in_specs=[pl.BlockSpec((n, f), lambda i: (0, 0))],
            out_specs=pl.BlockSpec((n, f), lambda i: (0, 0)),
        ),
        compiler_params=pltpu.CompilerParams(
            dimension_semantics=("arbitrary",),
        ),
    )(x2)


def flat_forward(x: jax.Array) -> jax.Array:
    """Pallas equivalent of `flat.forward`: flatten all dims except batch."""
    n = x.shape[0]
    flat_dim = math.prod(x.shape[1:]) if x.ndim > 1 else 1
    total = n * flat_dim

    if total % _LANE == 0:
        rows = total // _LANE
        # Free, contiguous (row-major) reshapes in the wrapper: no HBM traffic.
        x2 = x.reshape(rows, _LANE)
        out2 = _tiled_copy_2d(x2)
        return out2.reshape(n, flat_dim)

    # Generality fallback (not hit by the example shape): full-array block.
    x2 = x.reshape(n, flat_dim)
    return _full_block_copy_2d(x2)


if __name__ == "__main__":
    # The module has no parameters (empty __init__), so nothing to initialize.
    key = jax.random.PRNGKey(0)
    x = jax.random.normal(key, (2, 4, 16, 16), dtype=jnp.float32)

    out = flat_forward(x)
    out = jax.block_until_ready(out)

    # Verify against the reference semantics of torch.flatten(x, 1).
    ref = x.reshape(x.shape[0], -1)
    assert out.shape == (2, 4 * 16 * 16), out.shape
    assert out.dtype == x.dtype
    assert jnp.array_equal(out, ref), "mismatch vs reference flatten"

    print("KERNEL_OK")
</pallas_src>

<mosaic_0001>
module attributes {stable_mosaic.version = 11 : i64} {
  func.func @_copy_kernel(%arg0: i32, %arg1: memref<16x128xf32, #tpu.memory_space<vmem>>, %arg2: memref<16x128xf32, #tpu.memory_space<vmem>>) attributes {dimension_semantics = [#tpu.dimension_semantics<parallel>], iteration_bounds = array<i64: 1>, scalar_prefetch = 0 : i64, scratch_operands = 0 : i64, tpu.core_type = #tpu.core_type<tc>, window_params = [{transform_indices = @transform_0, window_bounds = array<i64: 16, 128>}, {transform_indices = @transform_1, window_bounds = array<i64: 16, 128>}]} {
    %c0 = arith.constant 0 : index
    %c0_0 = arith.constant 0 : index
    %0 = vector.load %arg1[%c0, %c0_0] : memref<16x128xf32, #tpu.memory_space<vmem>>, vector<16x128xf32>
    %c0_1 = arith.constant 0 : index
    %c0_2 = arith.constant 0 : index
    %1 = vector.load %arg2[%c0_1, %c0_2] : memref<16x128xf32, #tpu.memory_space<vmem>>, vector<16x128xf32>
    tpu.vector_store %arg2[%c0_1, %c0_2], %0 {strides = array<i32>} : memref<16x128xf32, #tpu.memory_space<vmem>>, vector<16x128xf32>,
    return
  }
  func.func @transform_0(%arg0: i32) -> (i32, i32) {
    %c0_i32 = arith.constant 0 : i32
    %c0_i32_0 = arith.constant 0 : i32
    return %arg0, %c0_i32 : i32, i32
  }
  func.func @transform_1(%arg0: i32) -> (i32, i32) {
    %c0_i32 = arith.constant 0 : i32
    %c0_i32_0 = arith.constant 0 : i32
    return %arg0, %c0_i32 : i32, i32
  }
}

</mosaic_0001>

<bundles_post_ra>
// kernel: tpu_custom_call.1
= control target key start
LH: loop header
LB: loop body
LE: loop exit
PB: predicated region body
PF: predicated region fallthrough
CT: control target
= control target key end

     0   :  { %6 = vsyncpa [#allocation3], 0  ;;  %s112_s0 = inlined_call_operand.hbm [shape: f32[16,128], index: 0, kind: input, shape index: {}]   ;;  %s113_s1 = inlined_call_operand.hbm [shape: f32[16,128], index: 1, kind: output, shape index: {}]  }
   0x1   :  { %7 = vsyncpa [#allocation4], 0  ;;  %s92_s6 = smov [#allocation2]  }
   0x2   :  { %s13_s7 = sshll.u32 %s92_s6, 4  ;;  %s14_s7 = int_to_ptr.vmem [resolvable:$true] %s13_s7 }
   0x3   :  { %s56_s8 = scalar_lea.vmem %s14_s7, 256  ;;  %p61_p1 = scmp.lt.s32.totalorder %s14_s7, %s14_s7 }
   0x4   :  { %p57_p0 = scmp.ne.s32.totalorder %s14_s7, %s56_s8  ;;  %p62_p2 = scmp.lt.s32.totalorder %s56_s8, %s56_s8 }
   0x6   :  { %p63_p3 = por %p62_p2, %p61_p1 }
   0x8   :  { %p64_p4 = pnand %p63_p3, %p57_p0 }
   0xa   :  { %67 = shalt.err (!%p64_p4)
}
   0xb   :  { %s93_s9 = smov 128   ;;  %s94_s10 = smov 8  }
   0xc   :  { %19 = dma.hbm_to_vmem [thread:$0]  %s112_s0, 256, %s14_s7, [#allocation3], %s93_s9, %s93_s9, %s94_s10  }
   0xd   :  { %88 = dma.done.wait [#allocation3], 256  }
   0xe   :  { %89 = vsyncadd [#allocation3], 4294967040  ;;  %s95_s13 = smov [#allocation5]   ;;  %v23_v0 = vld [vmem:[#allocation2] sm:$0xff]  ;;  %v24_v1 = vld [vmem:[#allocation2 + $0x8] sm:$0xff] }
   0xf   :  { %s32_s14 = sshll.u32 %s95_s13, 4  ;;  %25 = vst [vmem:[#allocation5] sm:$0xff] %v23_v0  ;;  %26 = vst [vmem:[#allocation5 + $0x8] sm:$0xff] %v24_v1  ;;  %s33_s14 = int_to_ptr.vmem [resolvable:$true] %s32_s14 }
  0x10   :  { %s68_s15 = scalar_lea.vmem %s33_s14, 256  ;;  %p73_p6 = scmp.lt.s32.totalorder %s33_s14, %s33_s14 }
  0x11   :  { %p69_p5 = scmp.ne.s32.totalorder %s33_s14, %s68_s15  ;;  %p74_p7 = scmp.lt.s32.totalorder %s68_s15, %s68_s15 }
  0x13   :  { %p75_p8 = por %p74_p7, %p73_p6 }
  0x15   :  { %p76_p9 = pnand %p75_p8, %p69_p5 }
  0x17   :  { %79 = shalt.err (!%p76_p9)
}
  0x18   :  { %38 = dma.vmem_to_hbm [thread:$0]  %s33_s14, 256, %s113_s1, [#allocation4], %s93_s9, %s93_s9, %s94_s10  }
  0x19   :  { %90 = dma.done.wait [#allocation4], 256  }
  0x1a   :  { %91 = vsyncadd [#allocation4], 4294967040 }
  0x1b   :  { %42 = vsyncpa [#allocation3], 1 }
  0x1c   :  { %43 = vsyncpa [#allocation4], 1 }

</bundles_post_ra>
